<compile_context>
chip_gen: v6e
topology: v6e:2x2x1
jax: 0.10.0
libtpu: 0.0.40
codegen_flags: <defaults>
</compile_context>

<pallas_src>
import functools

import jax
import jax.numpy as jnp
from jax.experimental import pallas as pl
from jax.experimental.pallas import tpu as pltpu

_VMEM_LIMIT_BYTES = 32 * 1024 * 1024  # safe on v5e/v6e/v7x; tiles stay well below


def _round_up(x, m):
    return ((x + m - 1) // m) * m


def _pick_tile(dim, max_tile=512):
    """Return (tile, padded_dim) for one grid axis.

    tile is a multiple of 128 (lane/MXU friendly; 512 = 2x256 for v6e/v7x MXUs)
    and padded_dim is an exact multiple of tile.
    """
    if dim >= max_tile:
        return max_tile, _round_up(dim, max_tile)
    t = _round_up(dim, 128)
    return t, t


# --------------------------------------------------------------------------
# Phase 1: x_1 = B_1^T @ x_0   (grid: edge tiles x node-reduction tiles)
# --------------------------------------------------------------------------
def _v2e_kernel(inc_t_ref, x0_ref, x1_ref):
    @pl.when(pl.program_id(1) == 0)
    def _():
        x1_ref[...] = jnp.zeros_like(x1_ref)

    inc_t = inc_t_ref[...].astype(jnp.float32)        # bf16 {0,1} -> f32, exact
    x1_ref[...] += jnp.dot(inc_t, x0_ref[...],
                           preferred_element_type=jnp.float32)


# --------------------------------------------------------------------------
# Phase 2: m = B_1 @ x_1 ; out = ((1+eps)*x_0 + m) @ W^T + b
#          (grid: node tiles x edge-reduction tiles)
# --------------------------------------------------------------------------
def _e2v_gin_kernel(inc_ref, x1_ref, x0_ref, wt_ref, b_ref, out_ref, acc_ref,
                    *, eps):
    k = pl.program_id(1)

    @pl.when(k == 0)
    def _():
        acc_ref[...] = jnp.zeros_like(acc_ref)

    inc = inc_ref[...].astype(jnp.float32)
    acc_ref[...] += jnp.dot(inc, x1_ref[...],
                            preferred_element_type=jnp.float32)

    @pl.when(k == pl.num_programs(1) - 1)
    def _():
        scale = 1.0 + float(eps)
        if scale == 1.0:                               # trace-time branch
            h = x0_ref[...] + acc_ref[...]
        else:
            h = scale * x0_ref[...] + acc_ref[...]
        out_ref[...] = (jnp.dot(h, wt_ref[...],
                                preferred_element_type=jnp.float32)
                        + b_ref[...]).astype(out_ref.dtype)


def unigin_layer(x_0, incidence_1, weight, bias, eps=0.0):
    """UniGINLayer forward.

    x_0         : (N, C) node features (float32)
    incidence_1 : (N, E) dense binary incidence matrix B_1
    weight      : (C, C) linear weight, PyTorch layout (out_features, in_features)
    bias        : (C,)   linear bias
    Returns (x_0_out: (N, C), x_1: (E, C)).
    """
    n_nodes, in_ch = x_0.shape
    n_edges = incidence_1.shape[1]

    tn, n_p = _pick_tile(n_nodes)     # node tile / padded node count
    te, e_p = _pick_tile(n_edges)     # edge tile / padded edge count
    c_p = _round_up(in_ch, 128)       # lane-dense channel width

    f32 = jnp.float32
    bf16 = jnp.bfloat16

    # Padded, layout-natural operands (built once in HBM by XLA).
    x0_p = jnp.zeros((n_p, c_p), f32).at[:n_nodes, :in_ch].set(x_0.astype(f32))
    inc_p = jnp.zeros((n_p, e_p), bf16).at[:n_nodes, :n_edges].set(
        incidence_1.astype(bf16))
    inc_t_p = jnp.zeros((e_p, n_p), bf16).at[:n_edges, :n_nodes].set(
        incidence_1.T.astype(bf16))
    wt_p = jnp.zeros((c_p, c_p), f32).at[:in_ch, :in_ch].set(
        weight.astype(f32).T)                      # pre-transposed: kernel does h @ W^T
    b_p = jnp.zeros((1, c_p), f32).at[0, :in_ch].set(bias.astype(f32))

    # ---------------- phase 1: x_1 = B_1^T @ x_0 ----------------
    x1_p = pl.pallas_call(
        _v2e_kernel,
        out_shape=jax.ShapeDtypeStruct((e_p, c_p), f32),
        grid=(e_p // te, n_p // tn),
        in_specs=[
            pl.BlockSpec((te, tn), lambda e, n: (e, n)),    # B_1^T tile
            pl.BlockSpec((tn, c_p), lambda e, n: (n, 0)),   # x_0 tile
        ],
        out_specs=pl.BlockSpec((te, c_p), lambda e, n: (e, 0)),
        compiler_params=pltpu.CompilerParams(
            dimension_semantics=("parallel", "arbitrary"),
            vmem_limit_bytes=_VMEM_LIMIT_BYTES),
        cost_estimate=pl.CostEstimate(
            flops=2 * e_p * n_p * c_p,
            transcendentals=0,
            bytes_accessed=e_p * n_p * 2 + n_p * c_p * 4 + e_p * c_p * 4),
    )(inc_t_p, x0_p)

    # -------- phase 2: m = B_1 @ x_1 ; GIN update + linear --------
    out_p = pl.pallas_call(
        functools.partial(_e2v_gin_kernel, eps=float(eps)),
        out_shape=jax.ShapeDtypeStruct((n_p, c_p), f32),
        grid=(n_p // tn, e_p // te),
        in_specs=[
            pl.BlockSpec((tn, te), lambda i, k: (i, k)),      # B_1 tile
            pl.BlockSpec((te, c_p), lambda i, k: (k, 0)),     # x_1 tile
            pl.BlockSpec((tn, c_p), lambda i, k: (i, 0)),     # x_0 tile (resident per i)
            pl.BlockSpec((c_p, c_p), lambda i, k: (0, 0)),    # W^T (resident)
            pl.BlockSpec((1, c_p), lambda i, k: (0, 0)),      # bias (resident)
        ],
        out_specs=pl.BlockSpec((tn, c_p), lambda i, k: (i, 0)),
        scratch_shapes=[pltpu.VMEM((tn, c_p), f32)],
        compiler_params=pltpu.CompilerParams(
            dimension_semantics=("parallel", "arbitrary"),
            vmem_limit_bytes=_VMEM_LIMIT_BYTES),
        cost_estimate=pl.CostEstimate(
            flops=2 * n_p * e_p * c_p + 2 * n_p * c_p * c_p,
            transcendentals=0,
            bytes_accessed=(n_p * e_p * 2 + e_p * c_p * 4 + n_p * c_p * 4
                            + c_p * c_p * 4 + c_p * 4 + n_p * c_p * 4)),
    )(inc_p, x1_p, x0_p, wt_p, b_p)

    return out_p[:n_nodes, :in_ch], x1_p[:n_edges, :in_ch]


def reference(x_0, incidence_1, weight, bias, eps=0.0):
    """Plain-JAX reference of the PyTorch forward."""
    x_1 = incidence_1.T @ x_0
    m = incidence_1 @ x_1
    return ((1.0 + eps) * x_0 + m) @ weight.T + bias, x_1


if __name__ == "__main__":
    key = jax.random.PRNGKey(0)
    k_x, k_inc, k_w, k_b = jax.random.split(key, 4)

    n_nodes, n_edges, in_channels = 16, 8, 32

    x_0 = jax.random.normal(k_x, (n_nodes, in_channels), dtype=jnp.float32)
    # Binary incidence matrix B_1 (nodes x hyperedges), deterministic.
    incidence_1 = (jax.random.uniform(k_inc, (n_nodes, n_edges)) < 0.3).astype(
        jnp.float32)

    # torch.nn.Linear(in_channels, in_channels) init: U(-1/sqrt(C), 1/sqrt(C))
    bound = 1.0 / jnp.sqrt(in_channels)
    weight = jax.random.uniform(k_w, (in_channels, in_channels),
                                minval=-bound, maxval=bound, dtype=jnp.float32)
    bias = jax.random.uniform(k_b, (in_channels,),
                              minval=-bound, maxval=bound, dtype=jnp.float32)

    eps = 0.0  # default: train_eps=False, use_norm=False
    x0_out, x1_out = unigin_layer(x_0, incidence_1, weight, bias, eps)
    jax.block_until_ready((x0_out, x1_out))

    x0_ref, x1_ref = reference(x_0, incidence_1, weight, bias, eps)
    assert x0_out.shape == (n_nodes, in_channels)
    assert x1_out.shape == (n_edges, in_channels)
    assert jnp.allclose(x0_out, x0_ref, atol=1e-5, rtol=1e-5)
    assert jnp.allclose(x1_out, x1_ref, atol=1e-5, rtol=1e-5)

    print("KERNEL_OK")
</pallas_src>

<mosaic_0001>
module attributes {stable_mosaic.version = 11 : i64} {
  func.func @_v2e_kernel(%arg0: i32, %arg1: i32, %arg2: memref<128x128xbf16, #tpu.memory_space<vmem>>, %arg3: memref<128x128xf32, #tpu.memory_space<vmem>>, %arg4: memref<128x128xf32, #tpu.memory_space<vmem>>) attributes {dimension_semantics = [#tpu.dimension_semantics<parallel>, #tpu.dimension_semantics<arbitrary>], iteration_bounds = array<i64: 1, 1>, scalar_prefetch = 0 : i64, scratch_operands = 0 : i64, tpu.core_type = #tpu.core_type<tc>, window_params = [{transform_indices = @transform_0, window_bounds = array<i64: 128, 128>}, {transform_indices = @transform_1, window_bounds = array<i64: 128, 128>}, {transform_indices = @transform_2, window_bounds = array<i64: 128, 128>}]} {
    %c0_i32 = arith.constant 0 : i32
    %0 = arith.cmpi eq, %arg1, %c0_i32 : i32
    %1 = arith.extui %0 : i1 to i32
    %c0_i32_0 = arith.constant 0 : i32
    %2 = arith.cmpi ne, %1, %c0_i32_0 : i32
    scf.if %2 {
      %cst_8 = arith.constant 0.000000e+00 : f32
      %10 = vector.broadcast %cst_8 : f32 to vector<128x128xf32>
      %c0_9 = arith.constant 0 : index
      %c0_10 = arith.constant 0 : index
      %11 = vector.load %arg4[%c0_9, %c0_10] : memref<128x128xf32, #tpu.memory_space<vmem>>, vector<128x128xf32>
      tpu.vector_store %arg4[%c0_9, %c0_10], %10 {strides = array<i32>} : memref<128x128xf32, #tpu.memory_space<vmem>>, vector<128x128xf32>,
    } else {
    }
    %c0 = arith.constant 0 : index
    %c0_1 = arith.constant 0 : index
    %3 = vector.load %arg2[%c0, %c0_1] : memref<128x128xbf16, #tpu.memory_space<vmem>>, vector<128x128xbf16>
    %4 = arith.extf %3 : vector<128x128xbf16> to vector<128x128xf32>
    %c0_2 = arith.constant 0 : index
    %c0_3 = arith.constant 0 : index
    %5 = vector.load %arg4[%c0_2, %c0_3] : memref<128x128xf32, #tpu.memory_space<vmem>>, vector<128x128xf32>
    %c0_4 = arith.constant 0 : index
    %c0_5 = arith.constant 0 : index
    %6 = vector.load %arg3[%c0_4, %c0_5] : memref<128x128xf32, #tpu.memory_space<vmem>>, vector<128x128xf32>
    %cst = arith.constant dense<0.000000e+00> : vector<128x128xf32>
    %7 = tpu.matmul %4, %6, %cst {dimension_numbers = #tpu.dot_dimension_numbers<[1], [0], [0], [1], [0, 0, 1, 1], [], []>} : vector<128x128xf32>, vector<128x128xf32>, vector<128x128xf32> -> vector<128x128xf32>
    %8 = arith.addf %5, %7 : vector<128x128xf32>
    %c0_6 = arith.constant 0 : index
    %c0_7 = arith.constant 0 : index
    %9 = vector.load %arg4[%c0_6, %c0_7] : memref<128x128xf32, #tpu.memory_space<vmem>>, vector<128x128xf32>
    tpu.vector_store %arg4[%c0_6, %c0_7], %8 {strides = array<i32>} : memref<128x128xf32, #tpu.memory_space<vmem>>, vector<128x128xf32>,
    return
  }
  func.func @transform_0(%arg0: i32, %arg1: i32) -> (i32, i32) {
    %c0_i32 = arith.constant 0 : i32
    return %arg0, %arg1 : i32, i32
  }
  func.func @transform_1(%arg0: i32, %arg1: i32) -> (i32, i32) {
    %c0_i32 = arith.constant 0 : i32
    %c0_i32_0 = arith.constant 0 : i32
    return %arg1, %c0_i32 : i32, i32
  }
  func.func @transform_2(%arg0: i32, %arg1: i32) -> (i32, i32) {
    %c0_i32 = arith.constant 0 : i32
    %c0_i32_0 = arith.constant 0 : i32
    return %arg0, %c0_i32 : i32, i32
  }
}

</mosaic_0001>

<bundles_post_ra>
// kernel: tpu_custom_call.1
= control target key start
LH: loop header
LB: loop body
LE: loop exit
PB: predicated region body
PF: predicated region fallthrough
CT: control target
= control target key end

     0   :  { %7 = vsyncpa [#allocation3], 0  ;;  %s589_s0 = inlined_call_operand.hbm [shape: bf16[128,128], index: 0, kind: input, shape index: {}]   ;;  %s590_s1 = inlined_call_operand.hbm [shape: f32[128,128], index: 1, kind: input, shape index: {}]   ;;  %s591_s2 = inlined_call_operand.hbm [shape: f32[128,128], index: 2, kind: output, shape index: {}]  }
   0x1   :  { %8 = vsyncpa [#allocation6], 0 }
   0x2   :  { %9 = vsyncpa [#allocation4], 0  ;;  %s552_s9 = smov [#allocation2]  }
   0x3   :  { %s15_s10 = sshll.u32 %s552_s9, 4  ;;  %s16_s10 = int_to_ptr.vmem [resolvable:$true] %s15_s10 }
   0x4   :  { %s494_s11 = scalar_lea.vmem %s16_s10, 1024  ;;  %p499_p1 = scmp.lt.s32.totalorder %s16_s10, %s16_s10 }
   0x5   :  { %p495_p0 = scmp.ne.s32.totalorder %s16_s10, %s494_s11  ;;  %p500_p2 = scmp.lt.s32.totalorder %s494_s11, %s494_s11 }
   0x7   :  { %p501_p3 = por %p500_p2, %p499_p1 }
   0x9   :  { %p502_p4 = pnand %p501_p3, %p495_p0 }
   0xb   :  { %505 = shalt.err (!%p502_p4)
}
   0xc   :  { %s553_s12 = smov 64   ;;  %s554_s13 = smov 4  }
   0xd   :  { %21 = dma.hbm_to_vmem [thread:$0]  %s589_s0, 1024, %s16_s10, [#allocation3], %s553_s12, %s553_s12, %s554_s13  }
   0xe   :  { %s555_s16 = smov [#allocation5]  }
   0xf   :  { %s27_s17 = sshll.u32 %s555_s16, 4  ;;  %s28_s17 = int_to_ptr.vmem [resolvable:$true] %s27_s17 }
  0x10   :  { %s514_s18 = scalar_lea.vmem %s28_s17, 2048  ;;  %p519_p6 = scmp.lt.s32.totalorder %s28_s17, %s28_s17 }
  0x11   :  { %p515_p5 = scmp.ne.s32.totalorder %s28_s17, %s514_s18  ;;  %p520_p7 = scmp.lt.s32.totalorder %s514_s18, %s514_s18 }
  0x13   :  { %p521_p8 = por %p520_p7, %p519_p6 }
  0x15   :  { %p522_p9 = pnand %p521_p8, %p515_p5 }
  0x17   :  { %525 = shalt.err (!%p522_p9)
}
  0x18   :  { %s556_s19 = smov 128   ;;  %s557_s20 = smov 8  }
  0x19   :  { %33 = dma.hbm_to_vmem [thread:$0]  %s590_s1, 2048, %s28_s17, [#allocation6], %s556_s19, %s556_s19, %s557_s20  }
  0x1a   :  { %546 = dma.done.wait [#allocation3], 1024  }
  0x1b   :  { %547 = vsyncadd [#allocation3], 4294966272 }
  0x1c   :  { %548 = dma.done.wait [#allocation6], 2048  }
  0x1d   :  { %549 = vsyncadd [#allocation6], 4294965248  ;;  %v123_v0 = vld [vmem:[#allocation5 + $0x78] sm:$0xff]  ;;  %v122_v1 = vld [vmem:[#allocation5 + $0x70] sm:$0xff]  ;;  %s558_s0 = smov [#allocation7]  }
  0x1e   :  { %390 = vmatprep.subr.mxu0 %v123_v0  ;;  %446 = vmatprep.subr.mxu1 %v123_v0  ;;  %v121_v2 = vld [vmem:[#allocation5 + $0x68] sm:$0xff]  ;;  %v120_v3 = vld [vmem:[#allocation5 + $0x60] sm:$0xff]  ;;  %v119_v4 = vld [vmem:[#allocation5 + $0x58] sm:$0xff]  ;;  %s306_s1 = sshll.u32 %s558_s0, 4  ;;  %s307_s1 = int_to_ptr.vmem [resolvable:$true] %s306_s1 }
  0x1f   :  { %391 = vmatpush3.msra.mxu0 %v123_v0  ;;  %462 = vmatpush3.msra.mxu1 %v123_v0  ;;  %v118_v5 = vld [vmem:[#allocation5 + $0x50] sm:$0xff]  ;;  %v117_v6 = vld [vmem:[#allocation5 + $0x48] sm:$0xff]  ;;  %v116_v7 = vld [vmem:[#allocation5 + $0x40] sm:$0xff]  ;;  %s526_s23 = scalar_lea.vmem %s307_s1, 2048  ;;  %p531_p11 = scmp.lt.s32.totalorder %s307_s1, %s307_s1 }
  0x20   :  { %392 = vmatprep.subr.mxu0 %v122_v1  ;;  %447 = vmatprep.subr.mxu1 %v122_v1  ;;  %v115_v8 = vld [vmem:[#allocation5 + $0x38] sm:$0xff]  ;;  %v114_v9 = vld [vmem:[#allocation5 + $0x30] sm:$0xff]  ;;  %v113_v10 = vld [vmem:[#allocation5 + $0x28] sm:$0xff]  ;;  %p527_p10 = scmp.ne.s32.totalorder %s307_s1, %s526_s23  ;;  %p532_p12 = scmp.lt.s32.totalorder %s526_s23, %s526_s23 }
  0x21   :  { %393 = vmatpush3.msra.mxu0 %v122_v1  ;;  %463 = vmatpush3.msra.mxu1 %v122_v1  ;;  %v112_v11 = vld [vmem:[#allocation5 + $0x20] sm:$0xff]  ;;  %v111_v12 = vld [vmem:[#allocation5 + $0x18] sm:$0xff]  ;;  %v110_v13 = vld [vmem:[#allocation5 + $0x10] sm:$0xff] }
  0x22   :  { %394 = vmatprep.subr.mxu0 %v121_v2  ;;  %448 = vmatprep.subr.mxu1 %v121_v2  ;;  %v109_v14 = vld [vmem:[#allocation5 + $0x8] sm:$0xff]  ;;  %v320_v15 = vld [vmem:[#allocation2] sm:$0xff]   ;;  %v352_v26 = vld [vmem:[#allocation2 + $0x10] sm:$0xff]   ;;  %p533_p13 = por %p532_p12, %p531_p11 }
  0x23   :  { %395 = vmatpush3.msra.mxu0 %v121_v2  ;;  %464 = vmatpush3.msra.mxu1 %v121_v2  ;;  %v354_v16 = vld [vmem:[#allocation2 + $0x20] sm:$0xff]   ;;  %v351_v18 = vld [vmem:[#allocation2 + $0x8] sm:$0xff]   ;;  %v321_v20 = vunpack.c.l.bf16 %v320_v15  ;;  %v322_v22 = vunpack.c.h.bf16 %v320_v15  ;;  %v356_v27 = vld [vmem:[#allocation2 + $0x30] sm:$0xff]   ;;  %v329_v30 = vunpack.c.l.bf16 %v352_v26  ;;  %v330_v34 = vunpack.c.h.bf16 %v352_v26 }
  0x24   :  { %396 = vmatprep.subr.mxu0 %v120_v3  ;;  %449 = vmatprep.subr.mxu1 %v120_v3  ;;  %v108_v17 = vld [vmem:[#allocation5] sm:$0xff]  ;;  %v355_v19 = vld [vmem:[#allocation2 + $0x28] sm:$0xff]   ;;  %v337_v21 = vunpack.c.l.bf16 %v354_v16  ;;  %v338_v23 = vunpack.c.h.bf16 %v354_v16  ;;  %v325_v24 = vunpack.c.l.bf16 %v351_v18  ;;  %v326_v28 = vunpack.c.h.bf16 %v351_v18  ;;  %v353_v32 = vld [vmem:[#allocation2 + $0x18] sm:$0xff]   ;;  %p534_p0 = pnand %p533_p13, %p527_p10 }
  0x25   :  { %397 = vmatpush3.msra.mxu0 %v120_v3  ;;  %465 = vmatpush3.msra.mxu1 %v120_v3  ;;  %v341_v25 = vunpack.c.l.bf16 %v355_v19  ;;  %v342_v29 = vunpack.c.h.bf16 %v355_v19  ;;  %v345_v31 = vunpack.c.l.bf16 %v356_v27  ;;  %v357_v33 = vld [vmem:[#allocation2 + $0x38] sm:$0xff]   ;;  %v346_v35 = vunpack.c.h.bf16 %v356_v27 }
  0x26   :  { %398 = vmatprep.subr.mxu0 %v119_v4  ;;  %450 = vmatprep.subr.mxu1 %v119_v4  ;;  %v333_v36 = vunpack.c.l.bf16 %v353_v32  ;;  %v349_v37 = vunpack.c.l.bf16 %v357_v33  ;;  %v334_v38 = vunpack.c.h.bf16 %v353_v32  ;;  %v350_v39 = vunpack.c.h.bf16 %v357_v33 }
  0x27   :  { %399 = vmatpush3.msra.mxu0 %v119_v4  ;;  %466 = vmatpush3.msra.mxu1 %v119_v4 }
  0x28   :  { %400 = vmatprep.subr.mxu0 %v118_v5  ;;  %451 = vmatprep.subr.mxu1 %v118_v5 }
  0x29   :  { %401 = vmatpush3.msra.mxu0 %v118_v5  ;;  %467 = vmatpush3.msra.mxu1 %v118_v5 }
  0x2a   :  { %402 = vmatprep.subr.mxu0 %v117_v6  ;;  %452 = vmatprep.subr.mxu1 %v117_v6 }
  0x2b   :  { %403 = vmatpush3.msra.mxu0 %v117_v6  ;;  %468 = vmatpush3.msra.mxu1 %v117_v6 }
  0x2c   :  { %404 = vmatprep.subr.mxu0 %v116_v7  ;;  %453 = vmatprep.subr.mxu1 %v116_v7 }
  0x2d   :  { %405 = vmatpush3.msra.mxu0 %v116_v7  ;;  %469 = vmatpush3.msra.mxu1 %v116_v7 }
  0x2e   :  { %406 = vmatprep.subr.mxu0 %v115_v8  ;;  %454 = vmatprep.subr.mxu1 %v115_v8 }
  0x2f   :  { %407 = vmatpush3.msra.mxu0 %v115_v8  ;;  %470 = vmatpush3.msra.mxu1 %v115_v8 }
  0x30   :  { %408 = vmatprep.subr.mxu0 %v114_v9  ;;  %455 = vmatprep.subr.mxu1 %v114_v9 }
  0x31   :  { %409 = vmatpush3.msra.mxu0 %v114_v9  ;;  %471 = vmatpush3.msra.mxu1 %v114_v9 }
  0x32   :  { %410 = vmatprep.subr.mxu0 %v113_v10  ;;  %456 = vmatprep.subr.mxu1 %v113_v10 }
  0x33   :  { %411 = vmatpush3.msra.mxu0 %v113_v10  ;;  %472 = vmatpush3.msra.mxu1 %v113_v10 }
  0x34   :  { %412 = vmatprep.subr.mxu0 %v112_v11  ;;  %457 = vmatprep.subr.mxu1 %v112_v11 }
  0x35   :  { %413 = vmatpush3.msra.mxu0 %v112_v11  ;;  %473 = vmatpush3.msra.mxu1 %v112_v11 }
  0x36   :  { %414 = vmatprep.subr.mxu0 %v111_v12  ;;  %458 = vmatprep.subr.mxu1 %v111_v12 }
  0x37   :  { %415 = vmatpush3.msra.mxu0 %v111_v12  ;;  %474 = vmatpush3.msra.mxu1 %v111_v12 }
  0x38   :  { %416 = vmatprep.subr.mxu0 %v110_v13  ;;  %459 = vmatprep.subr.mxu1 %v110_v13 }
  0x39   :  { %417 = vmatpush3.msra.mxu0 %v110_v13  ;;  %475 = vmatpush3.msra.mxu1 %v110_v13 }
  0x3a   :  { %418 = vmatprep.subr.mxu0 %v109_v14  ;;  %460 = vmatprep.subr.mxu1 %v109_v14 }
  0x3b   :  { %419 = vmatpush3.msra.mxu0 %v109_v14  ;;  %476 = vmatpush3.msra.mxu1 %v109_v14 }
  0x3c   :  { %420 = vmatprep.subr.mxu0 %v108_v17  ;;  %461 = vmatprep.subr.mxu1 %v108_v17 }
  0x3d   :  { %421 = vmatpush3.msra.mxu0 %v108_v17  ;;  %477 = vmatpush3.msra.mxu1 %v108_v17 }
  0x3e   :  { %422 = vmatprep.mubr.f32.mxu0 %v321_v20  ;;  %434 = vmatprep.mubr.f32.mxu1 %v337_v21 }
  0x3f   :  { %423 = vmatmul.mubr.f32.vlgmr.msra.gmra.mxu0 %v322_v22  ;;  %435 = vmatmul.mubr.f32.vlgmr.msra.gmra.mxu1 %v338_v23 }
  0x40   :  { %425 = vmatprep.mubr.f32.mxu0 %v325_v24  ;;  %437 = vmatprep.mubr.f32.mxu1 %v341_v25 }
  0x43   :  { %426 = vmatmul.mubr.f32.gmra.mxu0 %v326_v28  ;;  %438 = vmatmul.mubr.f32.gmra.mxu1 %v342_v29 }
  0x44   :  { %428 = vmatprep.mubr.f32.mxu0 %v329_v30  ;;  %440 = vmatprep.mubr.f32.mxu1 %v345_v31 }
  0x47   :  { %429 = vmatmul.mubr.f32.gmra.mxu0 %v330_v34  ;;  %441 = vmatmul.mubr.f32.gmra.mxu1 %v346_v35 }
  0x48   :  { %431 = vmatprep.mubr.f32.mxu0 %v333_v36  ;;  %443 = vmatprep.mubr.f32.mxu1 %v349_v37 }
  0x4b   :  { %432 = vmatmul.mubr.f32.gmra.mxu0 %v334_v38  ;;  %444 = vmatmul.mubr.f32.gmra.mxu1 %v350_v39 }
  0xff   :  { %v424_v40 = vpop.f32.mrf.mxu0  ;;  %v436_v41 = vpop.f32.mrf.mxu1 }
 0x100   :  { %286 = vst [vmem:[#allocation7 + $0x8] sm:$0xff] %v424_v40  ;;  %294 = vst [vmem:[#allocation7 + $0x48] sm:$0xff] %v436_v41 }
 0x101   :  { %v190_v42 = vpop.f32.mrf.mxu0  ;;  %v230_v43 = vpop.f32.mrf.mxu1 }
 0x102   :  { %285 = vst [vmem:[#allocation7] sm:$0xff] %v190_v42  ;;  %293 = vst [vmem:[#allocation7 + $0x40] sm:$0xff] %v230_v43 }
 0x103   :  { %v427_v44 = vpop.f32.mrf.mxu0  ;;  %v439_v45 = vpop.f32.mrf.mxu1 }
 0x104   :  { %288 = vst [vmem:[#allocation7 + $0x18] sm:$0xff] %v427_v44  ;;  %296 = vst [vmem:[#allocation7 + $0x58] sm:$0xff] %v439_v45 }
 0x105   :  { %v200_v46 = vpop.f32.mrf.mxu0  ;;  %v240_v47 = vpop.f32.mrf.mxu1 }
 0x106   :  { %287 = vst [vmem:[#allocation7 + $0x10] sm:$0xff] %v200_v46  ;;  %295 = vst [vmem:[#allocation7 + $0x50] sm:$0xff] %v240_v47 }
 0x107   :  { %v430_v48 = vpop.f32.mrf.mxu0  ;;  %v442_v49 = vpop.f32.mrf.mxu1 }
 0x108   :  { %290 = vst [vmem:[#allocation7 + $0x28] sm:$0xff] %v430_v48  ;;  %298 = vst [vmem:[#allocation7 + $0x68] sm:$0xff] %v442_v49 }
 0x109   :  { %v210_v50 = vpop.f32.mrf.mxu0  ;;  %v250_v51 = vpop.f32.mrf.mxu1 }
 0x10a   :  { %289 = vst [vmem:[#allocation7 + $0x20] sm:$0xff] %v210_v50  ;;  %297 = vst [vmem:[#allocation7 + $0x60] sm:$0xff] %v250_v51 }
 0x10b   :  { %v433_v52 = vpop.f32.mrf.mxu0  ;;  %v445_v53 = vpop.f32.mrf.mxu1 }
 0x10c   :  { %292 = vst [vmem:[#allocation7 + $0x38] sm:$0xff] %v433_v52  ;;  %300 = vst [vmem:[#allocation7 + $0x78] sm:$0xff] %v445_v53 }
 0x10d   :  { %v220_v54 = vpop.f32.mrf.mxu0  ;;  %v260_v55 = vpop.f32.mrf.mxu1 }
 0x10e   :  { %291 = vst [vmem:[#allocation7 + $0x30] sm:$0xff] %v220_v54  ;;  %299 = vst [vmem:[#allocation7 + $0x70] sm:$0xff] %v260_v55 }
 0x10f   :  { %537 = shalt.err (!%p534_p0)
}
 0x110   :  { %312 = dma.vmem_to_hbm [thread:$0]  %s307_s1, 2048, %s591_s2, [#allocation4], %s556_s19, %s556_s19, %s557_s20  }
 0x111   :  { %550 = dma.done.wait [#allocation4], 2048  }
 0x112   :  { %551 = vsyncadd [#allocation4], 4294965248 }
 0x113   :  { %316 = vsyncpa [#allocation3], 1 }
 0x114   :  { %317 = vsyncpa [#allocation6], 1 }
 0x115   :  { %318 = vsyncpa [#allocation4], 1 }

</bundles_post_ra>
